<compile_context>
chip_gen: v7x
topology: tpu7x:2x2x1
jax: 0.10.0
libtpu: 0.0.40
codegen_flags: <defaults>
</compile_context>

<pallas_src>
import functools

import jax
import jax.numpy as jnp
from jax.experimental import pallas as pl
from jax.experimental.pallas import tpu as pltpu

# cfg.px_num -> 2 (synthetic config): c = 4**2 = 16, n = 4, c_out = 4
PX_NUM = 2
C_IN = 4 ** PX_NUM          # 16
C_OUT = C_IN // 4           # 4


def _round_up(x, m):
    return ((x + m - 1) // m) * m


def _binning_kernel(x_ref, w_ref, o_ref):
    # x_ref: (G*C_IN, TL)   w_ref: (G*C_OUT, G*C_IN)   o_ref: (G*C_OUT, TL)
    # Single MXU dot; output lane dim = TL (lane-dense, unmasked full-tile
    # stores when G*C_OUT is a multiple of 8).
    o_ref[...] = jnp.dot(
        w_ref[...], x_ref[...], preferred_element_type=jnp.float32
    ).astype(o_ref.dtype)


@functools.partial(jax.jit, static_argnames=("tl_max",))
def binnings_forward(x_nchw, weight, *, tl_max=65536):
    """x_nchw: (N, C_IN, H, W); weight: (C_OUT, C_IN) (PyTorch conv weight
    squeezed from (C_OUT, C_IN, 1, 1), bias=False).  Returns (N, C_OUT, H, W)."""
    N, C, H, W = x_nchw.shape
    assert C == C_IN and weight.shape == (C_OUT, C_IN)
    HW = H * W

    # Batch-packing factor: G=2 for f32 gives G*C_OUT = 8 output sublanes
    # (one full (8,128) tile).  Fall back to G=1 for odd batch sizes.
    G = 2 if N % 2 == 0 else 1
    GCI, GCO = G * C_IN, G * C_OUT

    # Free HBM-level reshape: fold G batches into the channel (sublane) dim.
    x3 = x_nchw.reshape(N // G, GCI, HW)

    # Block-diagonal weight so one dot handles all G packed batches:
    # w_bd[g*C_OUT + o, g*C_IN + c] = weight[o, c].
    w_bd = jnp.kron(jnp.eye(G, dtype=weight.dtype), weight)      # (GCO, GCI)

    # Lane tile: big multiple of 128 (multi-MiB per step), clamped so tiny
    # inputs get a single block.  f32, G=2: 160*TL bytes/step of HBM traffic,
    # ~2*(GCI+GCO)*4*TL bytes of double-buffered VMEM (20 MiB at TL=65536).
    TL = min(tl_max, _round_up(HW, 128))
    grid = (N // G, pl.cdiv(HW, TL))

    itemsize = jnp.dtype(x_nchw.dtype).itemsize
    cost = pl.CostEstimate(
        flops=2 * N * HW * C_IN * C_OUT,
        transcendentals=0,
        bytes_accessed=(N * C_IN * HW + N * C_OUT * HW) * itemsize
        + GCO * GCI * jnp.dtype(weight.dtype).itemsize,
    )

    out3 = pl.pallas_call(
        _binning_kernel,
        out_shape=jax.ShapeDtypeStruct((N // G, GCO, HW), x_nchw.dtype),
        grid_spec=pltpu.PrefetchScalarGridSpec(
            num_scalar_prefetch=0,
            grid=grid,
            in_specs=[
                pl.BlockSpec((pl.Squeezed(), GCI, TL), lambda b, j: (b, 0, j)),
                pl.BlockSpec((GCO, GCI), lambda b, j: (0, 0)),
            ],
            out_specs=pl.BlockSpec((pl.Squeezed(), GCO, TL), lambda b, j: (b, 0, j)),
        ),
        compiler_params=pltpu.CompilerParams(
            dimension_semantics=("parallel", "parallel"),
            vmem_limit_bytes=48 << 20,   # safe on v5e/v6e (128 MiB) and v7x (64 MiB)
        ),
        cost_estimate=cost,
    )(x3, w_bd)

    # Free reshapes back: (N//G, G*C_OUT, HW) -> (N, C_OUT, H, W).
    return out3.reshape(N, C_OUT, H, W)


if __name__ == "__main__":
    key = jax.random.PRNGKey(0)
    k_x, k_w = jax.random.split(key)

    # Small deterministic shapes: batch=2, C_IN=16, spatial=16x16
    N, H, W = 2, 16, 16
    x = jax.random.normal(k_x, (N, C_IN, H, W), dtype=jnp.float32)

    # Kaiming-uniform-like init for the squeezed (C_OUT, C_IN) conv weight.
    fan_in = C_IN  # kernel_size = 1
    bound = 1.0 / (fan_in ** 0.5)
    weight = jax.random.uniform(
        k_w, (C_OUT, C_IN), dtype=jnp.float32, minval=-bound, maxval=bound
    )

    out = binnings_forward(x, weight)
    out = jax.block_until_ready(out)

    # Reference check against plain-JAX 1x1 conv semantics.
    ref = jnp.einsum("nchw,oc->nohw", x, weight)
    assert out.shape == (N, C_OUT, H, W), out.shape
    assert jnp.allclose(out, ref, atol=1e-5, rtol=1e-5)

    print("KERNEL_OK")
</pallas_src>

<mosaic_0001>
module attributes {stable_mosaic.version = 11 : i64} {
  func.func @_binning_kernel(%arg0: i32, %arg1: i32, %arg2: memref<1x32x256xf32, #tpu.memory_space<vmem>>, %arg3: memref<8x32xf32, #tpu.memory_space<vmem>>, %arg4: memref<1x8x256xf32, #tpu.memory_space<vmem>>) attributes {dimension_semantics = [#tpu.dimension_semantics<parallel>, #tpu.dimension_semantics<parallel>], iteration_bounds = array<i64: 1, 1>, scalar_prefetch = 0 : i64, scratch_operands = 0 : i64, tpu.core_type = #tpu.core_type<tc>, window_params = [{transform_indices = @transform_0, window_bounds = array<i64: 1, 32, 256>}, {pipeline_mode = #tpu.pipeline_mode<synchronous>, transform_indices = @transform_1, window_bounds = array<i64: 8, 32>}, {transform_indices = @transform_2, window_bounds = array<i64: 1, 8, 256>}]} {
    %c0 = arith.constant 0 : index
    %c0_0 = arith.constant 0 : index
    %0 = vector.load %arg3[%c0, %c0_0] : memref<8x32xf32, #tpu.memory_space<vmem>>, vector<8x32xf32>
    %c0_1 = arith.constant 0 : index
    %c0_2 = arith.constant 0 : index
    %c0_3 = arith.constant 0 : index
    %1 = vector.load %arg2[%c0_1, %c0_2, %c0_3] : memref<1x32x256xf32, #tpu.memory_space<vmem>>, vector<1x32x256xf32>
    %2 = vector.shape_cast %1 : vector<1x32x256xf32> to vector<32x256xf32>
    %cst = arith.constant dense<0.000000e+00> : vector<8x256xf32>
    %3 = tpu.matmul %0, %2, %cst {dimension_numbers = #tpu.dot_dimension_numbers<[1], [0], [0], [1], [0, 0, 1, 1], [], []>} : vector<8x32xf32>, vector<32x256xf32>, vector<8x256xf32> -> vector<8x256xf32>
    %c0_4 = arith.constant 0 : index
    %c0_5 = arith.constant 0 : index
    %c0_6 = arith.constant 0 : index
    %4 = vector.load %arg4[%c0_4, %c0_5, %c0_6] : memref<1x8x256xf32, #tpu.memory_space<vmem>>, vector<1x8x256xf32>
    %5 = vector.shape_cast %4 : vector<1x8x256xf32> to vector<8x256xf32>
    %6 = vector.shape_cast %3 : vector<8x256xf32> to vector<1x8x256xf32>
    tpu.vector_store %arg4[%c0_4, %c0_5, %c0_6], %6 {strides = array<i32>} : memref<1x8x256xf32, #tpu.memory_space<vmem>>, vector<1x8x256xf32>,
    return
  }
  func.func @transform_0(%arg0: i32, %arg1: i32) -> (i32, i32, i32) {
    %c0_i32 = arith.constant 0 : i32
    %c0_i32_0 = arith.constant 0 : i32
    return %arg0, %c0_i32, %arg1 : i32, i32, i32
  }
  func.func @transform_1(%arg0: i32, %arg1: i32) -> (i32, i32) {
    %c0_i32 = arith.constant 0 : i32
    %c0_i32_0 = arith.constant 0 : i32
    %c0_i32_1 = arith.constant 0 : i32
    return %c0_i32, %c0_i32_0 : i32, i32
  }
  func.func @transform_2(%arg0: i32, %arg1: i32) -> (i32, i32, i32) {
    %c0_i32 = arith.constant 0 : i32
    %c0_i32_0 = arith.constant 0 : i32
    return %arg0, %c0_i32, %arg1 : i32, i32, i32
  }
}

</mosaic_0001>

<bundles_post_ra>
// kernel: binnings_forward.1
= control target key start
LH: loop header
LB: loop body
LE: loop exit
PB: predicated region body
PF: predicated region fallthrough
CT: control target
= control target key end

     0   :  { %v111_v3 = vmov 0.0   ;;  %vm20_vm0 = vcmask 261120   ;;  %s160_s0 = inlined_call_operand.vmem [shape: f32[1,32,256], index: 0, kind: input, shape index: {}]   ;;  %s161_s1 = inlined_call_operand.vmem [shape: f32[8,32], index: 1, kind: input, shape index: {}]   ;;  %s162_s2 = inlined_call_operand.vmem [shape: f32[1,8,256], index: 2, kind: output, shape index: {}]  }
   0x1   :  { %v13_v0 = vld [vmem:[%s160_s0 + $0x8] sm:$0xff]  ;;  %v15_v1 = vld [vmem:[%s160_s0 + $0x18] sm:$0xff]  ;;  %v12_v2 = vld [vmem:[%s160_s0] sm:$0xff]  ;;  %88 = vmatprep.mubr.f32.mxu0 %v111_v3 }
   0x2   :  { %v102_v4 = vpack.c.bf16 %v15_v1, %v13_v0  ;;  %v14_v5 = vld [vmem:[%s160_s0 + $0x10] sm:$0xff]  ;;  %v17_v6 = vld [vmem:[%s160_s0 + $0x28] sm:$0xff]  ;;  %v19_v7 = vld [vmem:[%s160_s0 + $0x38] sm:$0xff] }
   0x3   :  { %v104_v8 = vpack.c.bf16 %v14_v5, %v12_v2  ;;  %v106_v9 = vpack.c.bf16 %v19_v7, %v17_v6  ;;  %v16_v10 = vld [vmem:[%s160_s0 + $0x20] sm:$0xff]  ;;  %v18_v11 = vld [vmem:[%s160_s0 + $0x30] sm:$0xff] }
   0x4   :  { %103 = vmatprep.subr.bf16.mxu0 %v102_v4  ;;  %v108_v12 = vpack.c.bf16 %v18_v11, %v16_v10  ;;  %v11_v13 = vld [vmem:[%s161_s1] sm:$0xff] }
   0x5   :  { %105 = vmatpush1.bf16.msra.mxu0 %v104_v8 }
   0x6   :  { %107 = vmatprep.subr.bf16.mxu0 %v106_v9 }
   0x9   :  { %109 = vmatpush1.bf16.msra.mxu0 %v108_v12 }
   0xc   :  { %101 = vmatmul.mubr.msk.f32.vlgmr.msra.gmra.mrb[0].mxu0 %vm20_vm0, %v11_v13 }
  0xdf   :  { %v90_v14 = vpop.f32.mrb[0].mxu0 }
  0xe0   :  { %95 = vst [vmem:[%s162_s2] sm:$0xff] %v90_v14  ;;  %v92_v15 = vpop.f32.mrb[1].mxu0 }
  0xe1   :  { %96 = vst [vmem:[%s162_s2 + $0x8] sm:$0xff] %v92_v15 }

</bundles_post_ra>
